<compile_context>
chip_gen: v7x
topology: tpu7x:2x2x1
jax: 0.10.0
libtpu: 0.0.40
codegen_flags: <defaults>
</compile_context>

<pallas_src>
import jax
import jax.numpy as jnp
from jax.experimental import pallas as pl
from jax.experimental.pallas import tpu as pltpu


def _make_kernel(sub):
    def kernel(qi_ref, qj_ref, zi_ref, zj_ref, o_ref):
        qi = qi_ref[...].astype(jnp.float32)
        qj = qj_ref[...].astype(jnp.float32)
        zi = zi_ref[...].astype(jnp.float32)
        zj = zj_ref[...].astype(jnp.float32)
        prod = qi * zj + qj * zi                         # (tm, d) -- VPU only
        tm, d = prod.shape
        # Fold row-blocks of `sub` rows with plain VPU adds (tile-aligned
        # reshape, no data movement); no cross-lane reduce in the inner loop.
        o_ref[...] = prod.reshape(tm // sub, sub, d).sum(axis=0)
    return kernel


def _pick_row_tile(n_rows, sub, max_tile):
    """Largest multiple of `sub` <= max_tile that divides n_rows."""
    t = min(max_tile, n_rows)
    t -= t % sub
    t = max(t, sub)
    while n_rows % t:
        t -= sub
    return t


def infonce_loss(q, z, *, max_row_tile=512, vmem_limit_bytes=None):
    """q, z: (ts, D) with ts = 2*bs. Returns the scalar f32 infoNCE/BYOL loss."""
    assert q.shape == z.shape, "q and z must have identical shapes"
    ts, d = q.shape
    assert ts % 2 == 0, "first dim must be 2*bs"
    bs = ts // 2

    in_itemsize = min(jnp.dtype(q.dtype).itemsize, jnp.dtype(z.dtype).itemsize)
    max_itemsize = max(jnp.dtype(q.dtype).itemsize, jnp.dtype(z.dtype).itemsize)
    # Sublane alignment: 8 rows for 32-bit inputs, 16 for 16-bit packed dtypes.
    sub = 8 if in_itemsize >= 4 else 16

    # Cap the row tile so 4 tiled inputs x 2 pipeline buffers stay well inside
    # the smallest default scoped-VMEM budget (v5e: 16 MiB).
    budget = 12 * 1024 * 1024
    auto_tile = max(sub, (budget // max(1, 8 * d * max_itemsize)) // sub * sub)
    row_cap = max(sub, min(max_row_tile, auto_tile))

    if bs % sub == 0:
        # Zero-copy path: pair top/bottom halves of q and z via index maps.
        tm = _pick_row_tile(bs, sub, row_cap)
        ntiles = bs // tm
        half_blocks = ntiles  # block offset of the second half inside q / z

        def lo(i):
            return (i, 0)

        def hi(i):
            return (i + half_blocks, 0)

        in_specs = [
            pl.BlockSpec((tm, d), lo),   # qi (rows [0, bs))
            pl.BlockSpec((tm, d), hi),   # qj (rows [bs, 2*bs))
            pl.BlockSpec((tm, d), lo),   # zi
            pl.BlockSpec((tm, d), hi),   # zj
        ]
        args = (q, q, z, z)
    else:
        # Unaligned bs (toy shapes): split + zero-pad each half. Zero rows
        # contribute nothing to the accumulated sum.
        pad = (-bs) % sub

        def pad_half(x):
            return jnp.pad(x, ((0, pad), (0, 0)))

        qi, qj = pad_half(q[:bs]), pad_half(q[bs:])
        zi, zj = pad_half(z[:bs]), pad_half(z[bs:])
        bsp = bs + pad
        tm = _pick_row_tile(bsp, sub, row_cap)
        ntiles = bsp // tm
        in_specs = [pl.BlockSpec((tm, d), lambda i: (i, 0)) for _ in range(4)]
        args = (qi, qj, zi, zj)

    cp_kwargs = dict(dimension_semantics=("parallel",))
    if vmem_limit_bytes is not None:
        cp_kwargs["vmem_limit_bytes"] = vmem_limit_bytes

    partials = pl.pallas_call(
        _make_kernel(sub),
        out_shape=jax.ShapeDtypeStruct((ntiles * sub, d), jnp.float32),
        grid_spec=pltpu.PrefetchScalarGridSpec(
            num_scalar_prefetch=0,
            grid=(ntiles,),
            in_specs=in_specs,
            out_specs=pl.BlockSpec((sub, d), lambda i: (i, 0)),
        ),
        compiler_params=pltpu.CompilerParams(**cp_kwargs),
    )(*args)

    # Single cross-lane/sublane reduce + scale per call (negligible vs. the
    # streamed input bytes); also makes the grid fully parallel (2-TC on v7x).
    total = jnp.sum(partials, dtype=jnp.float32)
    return jnp.float32(4.0) - (jnp.float32(2.0) / jnp.float32(bs)) * total


def infonce_ref(q, z):
    """Pure-JAX reference for validation (mirrors the PyTorch module)."""
    ts = q.shape[0]
    bs = ts // 2
    qi, qj = q[:bs].astype(jnp.float32), q[bs:].astype(jnp.float32)
    zi, zj = z[:bs].astype(jnp.float32), z[bs:].astype(jnp.float32)
    loss1 = 2.0 - 2.0 * jnp.sum(qi * zj, axis=-1)
    loss2 = 2.0 - 2.0 * jnp.sum(qj * zi, axis=-1)
    return jnp.mean(loss1 + loss2)


if __name__ == "__main__":
    key = jax.random.PRNGKey(0)
    k1, k2, k3, k4 = jax.random.split(key, 4)

    # Case 1: toy unaligned shape (bs=4 -> padded path), ts=2*bs=8, hidden=32.
    ts, d = 8, 32
    q = jax.random.normal(k1, (ts, d), dtype=jnp.float32)
    z = jax.random.normal(k2, (ts, d), dtype=jnp.float32)
    loss = infonce_loss(q, z)
    jax.block_until_ready(loss)
    ref = infonce_ref(q, z)
    assert jnp.allclose(loss, ref, atol=1e-4, rtol=1e-4), (loss, ref)

    # Case 2: aligned shape exercising the tiled, index-map-paired path
    # (bs=64, 4 grid steps with max_row_tile=16).
    ts2, d2 = 128, 128
    q2 = jax.random.normal(k3, (ts2, d2), dtype=jnp.float32)
    z2 = jax.random.normal(k4, (ts2, d2), dtype=jnp.float32)
    loss2 = infonce_loss(q2, z2, max_row_tile=16)
    jax.block_until_ready(loss2)
    ref2 = infonce_ref(q2, z2)
    assert jnp.allclose(loss2, ref2, atol=1e-4, rtol=1e-4), (loss2, ref2)

    print("KERNEL_OK")
</pallas_src>

<mosaic_0001>
module attributes {stable_mosaic.version = 11 : i64} {
  func.func @kernel(%arg0: i32, %arg1: memref<8x32xf32, #tpu.memory_space<vmem>>, %arg2: memref<8x32xf32, #tpu.memory_space<vmem>>, %arg3: memref<8x32xf32, #tpu.memory_space<vmem>>, %arg4: memref<8x32xf32, #tpu.memory_space<vmem>>, %arg5: memref<8x32xf32, #tpu.memory_space<vmem>>) attributes {dimension_semantics = [#tpu.dimension_semantics<parallel>], iteration_bounds = array<i64: 1>, scalar_prefetch = 0 : i64, scratch_operands = 0 : i64, tpu.core_type = #tpu.core_type<tc>, window_params = [{transform_indices = @transform_0, window_bounds = array<i64: 8, 32>}, {transform_indices = @transform_1, window_bounds = array<i64: 8, 32>}, {transform_indices = @transform_2, window_bounds = array<i64: 8, 32>}, {transform_indices = @transform_3, window_bounds = array<i64: 8, 32>}, {transform_indices = @transform_4, window_bounds = array<i64: 8, 32>}]} {
    %c0 = arith.constant 0 : index
    %c0_0 = arith.constant 0 : index
    %0 = vector.load %arg1[%c0, %c0_0] : memref<8x32xf32, #tpu.memory_space<vmem>>, vector<8x32xf32>
    %c0_1 = arith.constant 0 : index
    %c0_2 = arith.constant 0 : index
    %1 = vector.load %arg2[%c0_1, %c0_2] : memref<8x32xf32, #tpu.memory_space<vmem>>, vector<8x32xf32>
    %c0_3 = arith.constant 0 : index
    %c0_4 = arith.constant 0 : index
    %2 = vector.load %arg3[%c0_3, %c0_4] : memref<8x32xf32, #tpu.memory_space<vmem>>, vector<8x32xf32>
    %c0_5 = arith.constant 0 : index
    %c0_6 = arith.constant 0 : index
    %3 = vector.load %arg4[%c0_5, %c0_6] : memref<8x32xf32, #tpu.memory_space<vmem>>, vector<8x32xf32>
    %4 = arith.mulf %0, %3 : vector<8x32xf32>
    %5 = arith.mulf %1, %2 : vector<8x32xf32>
    %6 = arith.addf %4, %5 : vector<8x32xf32>
    %7 = vector.shape_cast %6 : vector<8x32xf32> to vector<1x8x32xf32>
    %cst = arith.constant dense<0.000000e+00> : vector<8x32xf32>
    %8 = vector.multi_reduction <add>, %7, %cst [0] : vector<1x8x32xf32> to vector<8x32xf32>
    %c0_7 = arith.constant 0 : index
    %c0_8 = arith.constant 0 : index
    %9 = vector.load %arg5[%c0_7, %c0_8] : memref<8x32xf32, #tpu.memory_space<vmem>>, vector<8x32xf32>
    tpu.vector_store %arg5[%c0_7, %c0_8], %8 {strides = array<i32>} : memref<8x32xf32, #tpu.memory_space<vmem>>, vector<8x32xf32>,
    return
  }
  func.func @transform_0(%arg0: i32) -> (i32, i32) {
    %c0_i32 = arith.constant 0 : i32
    %c0_i32_0 = arith.constant 0 : i32
    return %arg0, %c0_i32 : i32, i32
  }
  func.func @transform_1(%arg0: i32) -> (i32, i32) {
    %c0_i32 = arith.constant 0 : i32
    %c0_i32_0 = arith.constant 0 : i32
    return %arg0, %c0_i32 : i32, i32
  }
  func.func @transform_2(%arg0: i32) -> (i32, i32) {
    %c0_i32 = arith.constant 0 : i32
    %c0_i32_0 = arith.constant 0 : i32
    return %arg0, %c0_i32 : i32, i32
  }
  func.func @transform_3(%arg0: i32) -> (i32, i32) {
    %c0_i32 = arith.constant 0 : i32
    %c0_i32_0 = arith.constant 0 : i32
    return %arg0, %c0_i32 : i32, i32
  }
  func.func @transform_4(%arg0: i32) -> (i32, i32) {
    %c0_i32 = arith.constant 0 : i32
    %c0_i32_0 = arith.constant 0 : i32
    return %arg0, %c0_i32 : i32, i32
  }
}

</mosaic_0001>

<bundles_post_ra>
// kernel: tpu_custom_call.1
= control target key start
LH: loop header
LB: loop body
LE: loop exit
PB: predicated region body
PF: predicated region fallthrough
CT: control target
= control target key end

     0   :  { %9 = vsyncpa [#allocation3], 0  ;;  %s257_s0 = inlined_call_operand.hbm [shape: f32[8,32], index: 0, kind: input, shape index: {}]   ;;  %s258_s1 = inlined_call_operand.hbm [shape: f32[8,32], index: 1, kind: input, shape index: {}]   ;;  %s259_s2 = inlined_call_operand.hbm [shape: f32[8,32], index: 2, kind: input, shape index: {}]   ;;  %s260_s3 = inlined_call_operand.vmem [shape: f32[8,32], index: 3, kind: input, shape index: {}]   ;;  %s261_s4 = inlined_call_operand.hbm [shape: f32[8,32], index: 4, kind: output, shape index: {}]  }
   0x1   :  { %10 = vsyncpa [#allocation6], 0 }
   0x2   :  { %11 = vsyncpa [#allocation4], 0  ;;  %s177_s15 = smov [#allocation5]   ;;  %s178_s17 = smov [#allocation2]  }
   0x3   :  { %s28_s16 = sshll.u32 %s177_s15, 4  ;;  %s18_s18 = sshll.u32 %s178_s17, 4  ;;  %s29_s16 = int_to_ptr.vmem [resolvable:$true] %s28_s16  ;;  %s19_s18 = int_to_ptr.vmem [resolvable:$true] %s18_s18 }
   0x4   :  { %s83_s21 = scalar_lea.hbm %s258_s1, 128 }
   0x5   :  { %p84_p0 = scmp.ne.s32.totalorder %s258_s1, %s83_s21  ;;  %p87_p1 = scmp.lt.u32.totalorder %s83_s21, %s258_s1 }
   0x7   :  { %p89_p2 = pnand %p87_p1, %p84_p0 }
   0x9   :  { %92 = shalt.err (!%p89_p2)
}
   0xa   :  { %s93_s26 = scalar_lea.vmem %s29_s16, 128  ;;  %p98_p4 = scmp.lt.s32.totalorder %s29_s16, %s29_s16 }
   0xb   :  { %p94_p3 = scmp.ne.s32.totalorder %s29_s16, %s93_s26  ;;  %p99_p5 = scmp.lt.s32.totalorder %s93_s26, %s93_s26 }
   0xd   :  { %p100_p6 = por %p99_p5, %p98_p4 }
   0xf   :  { %p101_p7 = pnand %p100_p6, %p94_p3 }
  0x11   :  { %104 = shalt.err (!%p101_p7)
}
  0x12   :  { %31 = dma.hbm_to_vmem [thread:$0]  %s258_s1, 128, %s29_s16, [#allocation6]  }
  0x13   :  { %s105_s5 = scalar_lea.hbm %s257_s0, 128 }
  0x14   :  { %p106_p8 = scmp.ne.s32.totalorder %s257_s0, %s105_s5  ;;  %p109_p9 = scmp.lt.u32.totalorder %s105_s5, %s257_s0 }
  0x16   :  { %p111_p10 = pnand %p109_p9, %p106_p8 }
  0x18   :  { %114 = shalt.err (!%p111_p10)
}
  0x19   :  { %s115_s10 = scalar_lea.vmem %s19_s18, 128  ;;  %p120_p12 = scmp.lt.s32.totalorder %s19_s18, %s19_s18 }
  0x1a   :  { %p116_p11 = scmp.ne.s32.totalorder %s19_s18, %s115_s10  ;;  %p121_p13 = scmp.lt.s32.totalorder %s115_s10, %s115_s10 }
  0x1c   :  { %p122_p0 = por %p121_p13, %p120_p12 }
  0x1e   :  { %p123_p1 = pnand %p122_p0, %p116_p11 }
  0x20   :  { %126 = shalt.err (!%p123_p1)
}
  0x21   :  { %21 = dma.hbm_to_vmem [thread:$0]  %s257_s0, 128, %s19_s18, [#allocation3]  }
  0x22   :  { %s179_s12 = smov [#allocation7]   ;;  %s127_s16 = scalar_lea.hbm %s259_s2, 128 }
  0x23   :  { %s38_s13 = sshll.u32 %s179_s12, 4  ;;  %p128_p2 = scmp.ne.s32.totalorder %s259_s2, %s127_s16  ;;  %s39_s13 = int_to_ptr.vmem [resolvable:$true] %s38_s13 }
  0x24   :  { %p131_p3 = scmp.lt.u32.totalorder %s127_s16, %s259_s2 }
  0x26   :  { %p133_p4 = pnand %p131_p3, %p128_p2 }
  0x28   :  { %136 = shalt.err (!%p133_p4)
}
  0x29   :  { %s137_s22 = scalar_lea.vmem %s39_s13, 128  ;;  %p142_p6 = scmp.lt.s32.totalorder %s39_s13, %s39_s13 }
  0x2a   :  { %p138_p5 = scmp.ne.s32.totalorder %s39_s13, %s137_s22  ;;  %p143_p7 = scmp.lt.s32.totalorder %s137_s22, %s137_s22 }
  0x2c   :  { %p144_p8 = por %p143_p7, %p142_p6 }
  0x2e   :  { %p145_p9 = pnand %p144_p8, %p138_p5 }
  0x30   :  { %148 = shalt.err (!%p145_p9)
}
  0x31   :  { %41 = dma.hbm_to_vmem [thread:$0]  %s259_s2, 128, %s39_s13, [#allocation6]  }
  0x32   :  { %171 = dma.done.wait [#allocation3], 128  }
  0x33   :  { %172 = vsyncadd [#allocation3], 4294967168 }
  0x34   :  { %173 = dma.done.wait [#allocation6], 256  }
  0x35   :  { %174 = vsyncadd [#allocation6], 4294967040  ;;  %v53_v0 = vld [vmem:[#allocation2] sm:$0xff]  ;;  %v54_v1 = vld [vmem:[#allocation5] sm:$0xff]  ;;  %s180_s25 = smov [#allocation8]   ;;  %vm61_vm0 = vcmask 261120  }
  0x36   :  { %v55_v2 = vld [vmem:[#allocation7] sm:$0xff]  ;;  %v56_v3 = vld [vmem:[%s260_s3] sm:$0xff]  ;;  %s69_s26 = sshll.u32 %s180_s25, 4  ;;  %s70_s26 = int_to_ptr.vmem [resolvable:$true] %s69_s26 }
  0x37   :  { %v58_v4 = vmul.f32 %v55_v2, %v54_v1  ;;  %v57_v5 = vmul.f32 %v56_v3, %v53_v0  ;;  %s149_s2 = scalar_lea.vmem %s70_s26, 128  ;;  %p154_p11 = scmp.lt.s32.totalorder %s70_s26, %s70_s26 }
  0x38   :  { %p150_p10 = scmp.ne.s32.totalorder %s70_s26, %s149_s2  ;;  %p155_p12 = scmp.lt.s32.totalorder %s149_s2, %s149_s2 }
  0x39   :  { %v59_v6 = vadd.f32 %v58_v4, %v57_v5 }
  0x3a   :  { %p156_p13 = por %p155_p12, %p154_p11 }
  0x3b   :  { %62 = vst.msk [vmem:[#allocation8] sm:$0xff] %vm61_vm0, %v59_v6 }
  0x3c   :  { %p157_p0 = pnand %p156_p13, %p150_p10 }
  0x3e   :  { %160 = shalt.err (!%p157_p0)
}
  0x3f   :  { %s161_s29 = scalar_lea.hbm %s261_s4, 128 }
  0x40   :  { %p162_p1 = scmp.ne.s32.totalorder %s261_s4, %s161_s29  ;;  %p165_p2 = scmp.lt.u32.totalorder %s161_s29, %s261_s4 }
  0x42   :  { %p167_p3 = pnand %p165_p2, %p162_p1 }
  0x44   :  { %170 = shalt.err (!%p167_p3)
}
  0x45   :  { %72 = dma.vmem_to_hbm [thread:$0]  %s70_s26, 128, %s261_s4, [#allocation4]  }
  0x46   :  { %175 = dma.done.wait [#allocation4], 128  }
  0x47   :  { %176 = vsyncadd [#allocation4], 4294967168 }
  0x48   :  { %76 = vsyncpa [#allocation3], 1 }
  0x49   :  { %77 = vsyncpa [#allocation6], 1 }
  0x4a   :  { %78 = vsyncpa [#allocation4], 1 }

</bundles_post_ra>
